<compile_context>
chip_gen: v7x
topology: tpu7x:2x2x1
jax: 0.10.0
libtpu: 0.0.40
codegen_flags: <defaults>
</compile_context>

<pallas_src>
import jax
import jax.numpy as jnp
import numpy as np
from jax.experimental import pallas as pl
from jax.experimental.pallas import tpu as pltpu

BN_EPS = 1e-5      # nn.BatchNorm2d default
K = 4              # ConvTranspose2d kernel size
S = K * K          # spatial footprint of the 4x4 output
ROW_ALIGN = 16     # bf16 sublane packing
LANE = 128


def _round_up(v, m):
    return ((v + m - 1) // m) * m


def _conv_bn_glu_kernel(x_ref, wa_ref, wb_ref, sa_ref, ba_ref, sb_ref, bb_ref, o_ref):
    # One (row-tile, column-tile):
    #   a = x @ Wa ; b = x @ Wb            (bf16 operands, f32 MXU accumulation)
    #   o = (a*scale_a + shift_a) * sigmoid(b*scale_b + shift_b)   (fused BN affine + GLU)
    x = x_ref[...]
    a = jnp.dot(x, wa_ref[...], preferred_element_type=jnp.float32)
    b = jnp.dot(x, wb_ref[...], preferred_element_type=jnp.float32)
    a = a * sa_ref[...] + ba_ref[...]
    b = b * sb_ref[...] + bb_ref[...]
    o_ref[...] = (a * jax.nn.sigmoid(b)).astype(o_ref.dtype)


def prepare_input_block_params(conv_weight, fmap_out):
    """Hoisted parameter prep (run once, not per forward): reshape the PyTorch
    ConvTranspose2d weight (res, 2*fmap_out, 4, 4) to bf16 (res, fmap_out*16) halves with
    column order (c_out, kh, kw) -- the GLU 'a' and 'b' halves."""
    res, c2, kh, kw = conv_weight.shape
    assert kh == K and kw == K and c2 == 2 * fmap_out
    w2d = conv_weight.reshape(res, c2 * S).astype(jnp.bfloat16)
    half = fmap_out * S
    return w2d[:, :half], w2d[:, half:]


def _pick_col_tile(half, cap=2048):
    if half % LANE != 0:
        return half                 # full extent (masked stores for odd fmap_out; correct)
    tc = min(half, cap)             # cap keeps the live weight block small on v7x (64 MiB)
    while half % tc != 0:
        tc -= LANE
    return tc


def _fold_bn(colsum, colsumsq, gamma, beta, count):
    # Per-channel batch stats -> per-column (scale, shift) so the kernel applies y*s + t.
    ch_sum = colsum.reshape(-1, S).sum(axis=1)
    ch_sumsq = colsumsq.reshape(-1, S).sum(axis=1)
    mean = ch_sum / count
    var = jnp.maximum(ch_sumsq / count - mean * mean, 0.0)   # clamp: avoids rsqrt(neg)
    scale_c = gamma.astype(jnp.float32) * jax.lax.rsqrt(var + BN_EPS)
    shift_c = beta.astype(jnp.float32) - mean * scale_c
    return (jnp.repeat(scale_c, S).reshape(1, -1),
            jnp.repeat(shift_c, S).reshape(1, -1))


def input_block_forward(x, w_a, w_b, bn_gamma, bn_beta, fmap_out, *,
                        tile_rows=256, out_dtype=jnp.bfloat16):
    """x: (N, res, 1, 1) NCHW latent. w_a/w_b: prepared bf16 (res, fmap_out*16) weight
    halves. Returns (N, fmap_out, 4, 4), bf16 by default (halves HBM writeback)."""
    N, res, H, W = x.shape
    assert H == 1 and W == 1, "InputBlock is used on a 1x1 latent input"
    HALF = fmap_out * S
    C2S = 2 * HALF
    assert w_a.shape == (res, HALF) and w_b.shape == (res, HALF)

    # ---- tiling: rows padded to a multiple of tile_n; >=2 row tiles for dual-TC v7x ----
    tile_rows = max(ROW_ALIGN, (int(tile_rows) // ROW_ALIGN) * ROW_ALIGN)
    n_ceil = _round_up(N, ROW_ALIGN)
    tile_n = min(n_ceil, tile_rows)
    if n_ceil // tile_n < 2 and n_ceil >= 2 * ROW_ALIGN:
        tile_n = _round_up(-(-N // 2), ROW_ALIGN)
    n_pad = _round_up(N, tile_n)
    num_row_tiles = n_pad // tile_n
    tc = _pick_col_tile(HALF)
    num_col_tiles = HALF // tc

    x2d = x[:, :, 0, 0]

    # ---- BatchNorm batch stats via the Gram trick (tiny XLA prelude) ----
    #   colsum   = (sum_n x) @ W
    #   colsumsq = sum_i W[i,c] * (G @ W)[i,c],  G = x^T x  (res x res)
    gram = jnp.einsum("ni,nj->ij", x2d, x2d)                       # (res, res) f32
    xsum = jnp.sum(x2d, axis=0)                                    # (res,)     f32
    g_ext = jnp.concatenate([gram, xsum[None, :]], axis=0).astype(jnp.bfloat16)
    count = float(N * S)
    ga = jnp.dot(g_ext, w_a, preferred_element_type=jnp.float32)   # (res+1, HALF)
    gb = jnp.dot(g_ext, w_b, preferred_element_type=jnp.float32)
    colsumsq_a = jnp.sum(w_a.astype(jnp.float32) * ga[:res], axis=0)
    colsumsq_b = jnp.sum(w_b.astype(jnp.float32) * gb[:res], axis=0)
    scale_a, shift_a = _fold_bn(ga[res], colsumsq_a,
                                bn_gamma[:fmap_out], bn_beta[:fmap_out], count)
    scale_b, shift_b = _fold_bn(gb[res], colsumsq_b,
                                bn_gamma[fmap_out:], bn_beta[fmap_out:], count)

    # ---- row-padded bf16 activations (zero rows are sliced off after the kernel) ----
    x_bf = x2d.astype(jnp.bfloat16)
    x_pad = x_bf if n_pad == N else jnp.zeros((n_pad, res), jnp.bfloat16).at[:N].set(x_bf)

    # ---- generation-aware VMEM budget ----
    out_bytes = jnp.dtype(out_dtype).itemsize
    est = (2 * tile_n * res * 2            # x tile, double-buffered bf16
           + 2 * 2 * res * tc * 2          # Wa + Wb column blocks, double-buffered bf16
           + 4 * 2 * tc * 4                # scale/shift blocks
           + 2 * tile_n * tc * out_bytes   # output tile, double-buffered
           + 2 * tile_n * tc * 4)          # f32 a/b intermediates
    try:
        vmem_cap = int(pltpu.get_tpu_info().vmem_capacity_bytes)
    except Exception:  # pragma: no cover - conservative fallback
        vmem_cap = 64 * 1024 * 1024
    vmem_budget = min(int(0.85 * vmem_cap), 100 * 1024 * 1024)
    vmem_limit = int(min(max(2 * est, 32 * 1024 * 1024), vmem_budget))

    cost = pl.CostEstimate(
        flops=2 * n_pad * res * C2S + 6 * n_pad * HALF,
        transcendentals=n_pad * HALF,
        bytes_accessed=(num_col_tiles * n_pad * res * 2 + res * C2S * 2
                        + n_pad * HALF * out_bytes + 4 * HALF * 4))

    # NOTE: the weight blocks change only with the (outer) column axis, so they stay
    # VMEM-resident across the inner row loop; default double-buffering is kept for
    # lowering portability (single-buffering them is a further v7x VMEM saving).
    out2d = pl.pallas_call(
        _conv_bn_glu_kernel,
        out_shape=jax.ShapeDtypeStruct((n_pad, HALF), out_dtype),
        grid=(num_col_tiles, num_row_tiles),          # cols outer, rows inner
        in_specs=[
            pl.BlockSpec((tile_n, res), lambda j, i: (i, 0)),
            pl.BlockSpec((res, tc), lambda j, i: (0, j)),
            pl.BlockSpec((res, tc), lambda j, i: (0, j)),
            pl.BlockSpec((1, tc), lambda j, i: (0, j)),
            pl.BlockSpec((1, tc), lambda j, i: (0, j)),
            pl.BlockSpec((1, tc), lambda j, i: (0, j)),
            pl.BlockSpec((1, tc), lambda j, i: (0, j)),
        ],
        out_specs=pl.BlockSpec((tile_n, tc), lambda j, i: (i, j)),
        compiler_params=pltpu.CompilerParams(
            dimension_semantics=("parallel", "parallel"),   # dual-TC split on v7x
            vmem_limit_bytes=vmem_limit),
        cost_estimate=cost,
    )(x_pad, w_a, w_b, scale_a, shift_a, scale_b, shift_b)

    # Column order is (c_out, kh, kw) so NCHW is a pure reshape (no transpose).
    return out2d[:N].reshape(N, fmap_out, K, K)


def reference_forward(x, conv_weight, bn_gamma, bn_beta, fmap_out):
    """Pure-JAX f32 reference matching the PyTorch forward (training-mode BatchNorm)."""
    x2d = x[:, :, 0, 0]
    conv = jnp.einsum("ni,ichw->nchw", x2d, conv_weight)
    mean = conv.mean(axis=(0, 2, 3), keepdims=True)
    var = jnp.square(conv - mean).mean(axis=(0, 2, 3), keepdims=True)
    yh = (conv - mean) / jnp.sqrt(var + BN_EPS)
    yh = yh * bn_gamma.reshape(1, -1, 1, 1) + bn_beta.reshape(1, -1, 1, 1)
    a, b = yh[:, :fmap_out], yh[:, fmap_out:]
    return a * jax.nn.sigmoid(b)


if __name__ == "__main__":
    # Small deterministic config: res (latent channels) = 4, fmap_out = 8, batch = 2.
    N, RES, FMAP_OUT = 2, 4, 8
    C2 = 2 * FMAP_OUT

    key = jax.random.PRNGKey(0)
    kx, kw = jax.random.split(key)
    x = jax.random.normal(kx, (N, RES, 1, 1), dtype=jnp.float32)
    conv_weight = 0.1 * jax.random.normal(kw, (RES, C2, 4, 4), dtype=jnp.float32)
    bn_gamma = jnp.ones((C2,), dtype=jnp.float32)   # PyTorch BatchNorm2d default init
    bn_beta = jnp.zeros((C2,), dtype=jnp.float32)
    # TODO(synk): BatchNorm running_mean/running_var momentum updates are training-state
    # side effects and are not produced; only the forward output is reproduced.

    w_a, w_b = prepare_input_block_params(conv_weight, FMAP_OUT)   # hoisted param prep

    fwd = jax.jit(lambda xx, wa, wb, g, b: input_block_forward(xx, wa, wb, g, b, FMAP_OUT))
    out = jax.block_until_ready(fwd(x, w_a, w_b, bn_gamma, bn_beta))

    ref = reference_forward(x, conv_weight, bn_gamma, bn_beta, FMAP_OUT)
    # bf16 MXU operands + bf16 output vs f32 reference: expect ~1% relative error.
    np.testing.assert_allclose(np.asarray(out.astype(jnp.float32)), np.asarray(ref),
                               rtol=4e-2, atol=4e-2)
    assert out.shape == (N, FMAP_OUT, 4, 4)

    print("KERNEL_OK")
</pallas_src>

<mosaic_0001>
module attributes {stable_mosaic.version = 11 : i64} {
  func.func @_conv_bn_glu_kernel(%arg0: i32, %arg1: i32, %arg2: memref<16x4xbf16, #tpu.memory_space<vmem>>, %arg3: memref<4x128xbf16, #tpu.memory_space<vmem>>, %arg4: memref<4x128xbf16, #tpu.memory_space<vmem>>, %arg5: memref<1x128xf32, #tpu.memory_space<vmem>>, %arg6: memref<1x128xf32, #tpu.memory_space<vmem>>, %arg7: memref<1x128xf32, #tpu.memory_space<vmem>>, %arg8: memref<1x128xf32, #tpu.memory_space<vmem>>, %arg9: memref<16x128xbf16, #tpu.memory_space<vmem>>) attributes {dimension_semantics = [#tpu.dimension_semantics<parallel>, #tpu.dimension_semantics<parallel>], iteration_bounds = array<i64: 1, 1>, scalar_prefetch = 0 : i64, scratch_operands = 0 : i64, tpu.core_type = #tpu.core_type<tc>, window_params = [{transform_indices = @transform_0, window_bounds = array<i64: 16, 4>}, {transform_indices = @transform_1, window_bounds = array<i64: 4, 128>}, {transform_indices = @transform_2, window_bounds = array<i64: 4, 128>}, {transform_indices = @transform_3, window_bounds = array<i64: 1, 128>}, {transform_indices = @transform_4, window_bounds = array<i64: 1, 128>}, {transform_indices = @transform_5, window_bounds = array<i64: 1, 128>}, {transform_indices = @transform_6, window_bounds = array<i64: 1, 128>}, {transform_indices = @transform_7, window_bounds = array<i64: 16, 128>}]} {
    %c0 = arith.constant 0 : index
    %c0_0 = arith.constant 0 : index
    %0 = vector.load %arg2[%c0, %c0_0] : memref<16x4xbf16, #tpu.memory_space<vmem>>, vector<16x4xbf16>
    %c0_1 = arith.constant 0 : index
    %c0_2 = arith.constant 0 : index
    %1 = vector.load %arg3[%c0_1, %c0_2] : memref<4x128xbf16, #tpu.memory_space<vmem>>, vector<4x128xbf16>
    %cst = arith.constant dense<0.000000e+00> : vector<16x128xf32>
    %2 = tpu.matmul %0, %1, %cst {dimension_numbers = #tpu.dot_dimension_numbers<[1], [0], [0], [1], [0, 0, 1, 1], [], []>} : vector<16x4xbf16>, vector<4x128xbf16>, vector<16x128xf32> -> vector<16x128xf32>
    %c0_3 = arith.constant 0 : index
    %c0_4 = arith.constant 0 : index
    %3 = vector.load %arg4[%c0_3, %c0_4] : memref<4x128xbf16, #tpu.memory_space<vmem>>, vector<4x128xbf16>
    %cst_5 = arith.constant dense<0.000000e+00> : vector<16x128xf32>
    %4 = tpu.matmul %0, %3, %cst_5 {dimension_numbers = #tpu.dot_dimension_numbers<[1], [0], [0], [1], [0, 0, 1, 1], [], []>} : vector<16x4xbf16>, vector<4x128xbf16>, vector<16x128xf32> -> vector<16x128xf32>
    %c0_6 = arith.constant 0 : index
    %c0_7 = arith.constant 0 : index
    %5 = vector.load %arg5[%c0_6, %c0_7] : memref<1x128xf32, #tpu.memory_space<vmem>>, vector<1x128xf32>
    %6 = vector.broadcast %5 : vector<1x128xf32> to vector<16x128xf32>
    %7 = arith.mulf %2, %6 : vector<16x128xf32>
    %c0_8 = arith.constant 0 : index
    %c0_9 = arith.constant 0 : index
    %8 = vector.load %arg6[%c0_8, %c0_9] : memref<1x128xf32, #tpu.memory_space<vmem>>, vector<1x128xf32>
    %9 = vector.broadcast %8 : vector<1x128xf32> to vector<16x128xf32>
    %10 = arith.addf %7, %9 : vector<16x128xf32>
    %c0_10 = arith.constant 0 : index
    %c0_11 = arith.constant 0 : index
    %11 = vector.load %arg7[%c0_10, %c0_11] : memref<1x128xf32, #tpu.memory_space<vmem>>, vector<1x128xf32>
    %12 = vector.broadcast %11 : vector<1x128xf32> to vector<16x128xf32>
    %13 = arith.mulf %4, %12 : vector<16x128xf32>
    %c0_12 = arith.constant 0 : index
    %c0_13 = arith.constant 0 : index
    %14 = vector.load %arg8[%c0_12, %c0_13] : memref<1x128xf32, #tpu.memory_space<vmem>>, vector<1x128xf32>
    %15 = vector.broadcast %14 : vector<1x128xf32> to vector<16x128xf32>
    %16 = arith.addf %13, %15 : vector<16x128xf32>
    %17 = arith.negf %16 : vector<16x128xf32>
    %18 = math.exp %17 : vector<16x128xf32>
    %cst_14 = arith.constant 1.000000e+00 : f32
    %19 = vector.broadcast %cst_14 : f32 to vector<16x128xf32>
    %20 = arith.addf %19, %18 : vector<16x128xf32>
    %21 = arith.divf %19, %20 : vector<16x128xf32>
    %22 = arith.mulf %10, %21 : vector<16x128xf32>
    %23 = arith.truncf %22 : vector<16x128xf32> to vector<16x128xbf16>
    %c0_15 = arith.constant 0 : index
    %c0_16 = arith.constant 0 : index
    %24 = vector.load %arg9[%c0_15, %c0_16] : memref<16x128xbf16, #tpu.memory_space<vmem>>, vector<16x128xbf16>
    tpu.vector_store %arg9[%c0_15, %c0_16], %23 {strides = array<i32>} : memref<16x128xbf16, #tpu.memory_space<vmem>>, vector<16x128xbf16>,
    return
  }
  func.func @transform_0(%arg0: i32, %arg1: i32) -> (i32, i32) {
    %c0_i32 = arith.constant 0 : i32
    %c0_i32_0 = arith.constant 0 : i32
    return %arg1, %c0_i32 : i32, i32
  }
  func.func @transform_1(%arg0: i32, %arg1: i32) -> (i32, i32) {
    %c0_i32 = arith.constant 0 : i32
    %c0_i32_0 = arith.constant 0 : i32
    return %c0_i32, %arg0 : i32, i32
  }
  func.func @transform_2(%arg0: i32, %arg1: i32) -> (i32, i32) {
    %c0_i32 = arith.constant 0 : i32
    %c0_i32_0 = arith.constant 0 : i32
    return %c0_i32, %arg0 : i32, i32
  }
  func.func @transform_3(%arg0: i32, %arg1: i32) -> (i32, i32) {
    %c0_i32 = arith.constant 0 : i32
    %c0_i32_0 = arith.constant 0 : i32
    return %c0_i32, %arg0 : i32, i32
  }
  func.func @transform_4(%arg0: i32, %arg1: i32) -> (i32, i32) {
    %c0_i32 = arith.constant 0 : i32
    %c0_i32_0 = arith.constant 0 : i32
    return %c0_i32, %arg0 : i32, i32
  }
  func.func @transform_5(%arg0: i32, %arg1: i32) -> (i32, i32) {
    %c0_i32 = arith.constant 0 : i32
    %c0_i32_0 = arith.constant 0 : i32
    return %c0_i32, %arg0 : i32, i32
  }
  func.func @transform_6(%arg0: i32, %arg1: i32) -> (i32, i32) {
    %c0_i32 = arith.constant 0 : i32
    %c0_i32_0 = arith.constant 0 : i32
    return %c0_i32, %arg0 : i32, i32
  }
  func.func @transform_7(%arg0: i32, %arg1: i32) -> (i32, i32) {
    %c0_i32 = arith.constant 0 : i32
    return %arg1, %arg0 : i32, i32
  }
}

</mosaic_0001>

<bundles_post_ra>
// kernel: squeeze.5
= control target key start
LH: loop header
LB: loop body
LE: loop exit
PB: predicated region body
PF: predicated region fallthrough
CT: control target
= control target key end

     0   :  { %s66_s8 = smov 80   ;;  %vm7_vm0 = vcmask 130048   ;;  %s67_s11 = smov 96   ;;  %s117_s0 = inlined_call_operand.vmem [shape: f32[128], index: 0, kind: input, shape index: {}]   ;;  %s118_s1 = inlined_call_operand.vmem [shape: f32[8,16], index: 1, kind: output, shape index: {}]  }
   0x1   :  { %v4_v0 = vld [vmem:[%s117_s0] sm:$0x1]  ;;  %s65_s0 = smov 112   ;;  %s68_s12 = smov 64  }
   0x2   :  { %5 = vst [vmem:[#allocation0] sm:$0x1] %v4_v0  ;;  %s69_s13 = smov 48   ;;  %s70_s14 = smov 32  }
   0x3   :  { %s71_s15 = smov 16  }
   0x9   :  { %v9_v1 = vld [vmem:[#allocation0] sm:$0x1]  }
   0xa   :  { %v21_v2 = vld [vmem:[#allocation0] sm:$0x1]   ;;  %10 = vrot.lane.b32.xlu0 %v9_v1, %s65_s0 }
   0xb   :  { %22 = vrot.lane.b32.xlu1 %v21_v2, %s66_s8  ;;  %v15_v3 = vld [vmem:[#allocation0] sm:$0x1]  }
   0xc   :  { %v27_v4 = vld [vmem:[#allocation0] sm:$0x1]  }
   0xd   :  { %v6_v5 = vld [vmem:[#allocation0] sm:$0x1]  }
   0xe   :  { %8 = vst.msk [vmem:[%s118_s1] sm:$0x1] %vm7_vm0, %v6_v5   ;;  %16 = vrot.lane.b32.xlu0 %v15_v3, %s67_s11  ;;  %v33_v6 = vld [vmem:[#allocation0] sm:$0x1]  }
   0xf   :  { %28 = vrot.lane.b32.xlu1 %v27_v4, %s68_s12  ;;  %v39_v7 = vld [vmem:[#allocation0] sm:$0x1]  }
  0x10   :  { %v45_v8 = vld [vmem:[#allocation0] sm:$0x1]  }
  0x12   :  { %34 = vrot.lane.b32.xlu0 %v33_v6, %s69_s13 }
  0x13   :  { %40 = vrot.lane.b32.xlu1 %v39_v7, %s70_s14 }
  0x16   :  { %46 = vrot.lane.b32.xlu0 %v45_v8, %s71_s15 }
  0x7c   :  { %v11_v9 = vpop.permute.xlu0 %10  }
  0x7d   :  { %v23_v10 = vpop.permute.xlu1 %22   ;;  %51 = vst.msk [vmem:[%s118_s1 + $0x1] sm:$0x1] %vm7_vm0, %v11_v9  }
  0x7e   :  { %53 = vst.msk [vmem:[%s118_s1 + $0x3] sm:$0x1] %vm7_vm0, %v23_v10  }
  0x80   :  { %v17_v11 = vpop.permute.xlu0 %16  }
  0x81   :  { %v29_v12 = vpop.permute.xlu1 %28   ;;  %52 = vst.msk [vmem:[%s118_s1 + $0x2] sm:$0x1] %vm7_vm0, %v17_v11  }
  0x82   :  { %54 = vst.msk [vmem:[%s118_s1 + $0x4] sm:$0x1] %vm7_vm0, %v29_v12  }
  0x84   :  { %v35_v13 = vpop.permute.xlu0 %34  }
  0x85   :  { %v41_v14 = vpop.permute.xlu1 %40   ;;  %55 = vst.msk [vmem:[%s118_s1 + $0x5] sm:$0x1] %vm7_vm0, %v35_v13  }
  0x86   :  { %56 = vst.msk [vmem:[%s118_s1 + $0x6] sm:$0x1] %vm7_vm0, %v41_v14  }
  0x88   :  { %v47_v15 = vpop.permute.xlu0 %46  }
  0x89   :  { %57 = vst.msk [vmem:[%s118_s1 + $0x7] sm:$0x1] %vm7_vm0, %v47_v15  }

// kernel: _lambda_.1
= control target key start
LH: loop header
LB: loop body
LE: loop exit
PB: predicated region body
PF: predicated region fallthrough
CT: control target
= control target key end

     0   :  { %vm39_vm0 = vcmask 1041408   ;;  %v238_v0 = vmov 0.0   ;;  %vm239_vm1 = vmmov 0   ;;  %vm35_vm2 = vcmask 31744   ;;  %s304_s2 = inlined_call_operand.vmem [shape: bf16[4,128], index: 2, kind: input, shape index: {}]   ;;  %s305_s0 = inlined_call_operand.vmem [shape: bf16[16,4], index: 0, kind: input, shape index: {}]   ;;  %s306_s1 = inlined_call_operand.vmem [shape: bf16[4,128], index: 1, kind: input, shape index: {}]   ;;  %s307_s5 = inlined_call_operand.vmem [shape: f32[1,128], index: 5, kind: input, shape index: {}]   ;;  %s308_s6 = inlined_call_operand.vmem [shape: f32[1,128], index: 6, kind: input, shape index: {}]   ;;  %s309_s3 = inlined_call_operand.vmem [shape: f32[1,128], index: 3, kind: input, shape index: {}]   ;;  %s310_s4 = inlined_call_operand.vmem [shape: f32[1,128], index: 4, kind: input, shape index: {}]   ;;  %s311_s7 = inlined_call_operand.vmem [shape: bf16[16,128], index: 7, kind: output, shape index: {}]  }
   0x1   :  { %221 = vmatprep.subr.bf16.mxu1 %v238_v0  ;;  %v84_v1 = vld [vmem:[%s304_s2] sm:$0x3]  ;;  %223 = vmatprep.mubr.msk.bf16.mxu1 %vm239_vm1, %v238_v0 }
   0x2   :  { %v86_v2 = vsel %vm39_vm0, %v84_v1, 0  ;;  %v229_v3 = vld [vmem:[%s305_s0] sm:$0xff]   ;;  %215 = vmatprep.subr.bf16.mxu0 %v238_v0  ;;  %217 = vmatprep.mubr.msk.bf16.mxu0 %vm239_vm1, %v238_v0 }
   0x3   :  { %v29_v4 = vld [vmem:[%s306_s1] sm:$0x3]  ;;  %222 = vmatpush3.bf16.msra.mxu1 %v86_v2 }
   0x4   :  { %v41_v5 = vsel %vm39_vm0, %v29_v4, 0  ;;  %v198_v6 = vld [vmem:[%s307_s5] ss:$0 sm:$0xff] }
   0x5   :  { %216 = vmatpush3.bf16.msra.mxu0 %v41_v5  ;;  %v199_v8 = vld [vmem:[%s308_s6] ss:$0 sm:$0xff] }
   0x6   :  { %224 = vmatmul.mubr.msk.bf16.vlgmr.msra.gmra.mrb[0].mxu1 %vm35_vm2, %v229_v3  ;;  %v196_v26 = vld [vmem:[%s309_s3] ss:$0 sm:$0xff] }
   0x7   :  { %v197_v28 = vld [vmem:[%s310_s4] ss:$0 sm:$0xff] }
   0x8   :  { %218 = vmatmul.mubr.msk.bf16.vlgmr.msra.gmra.mrb[0].mxu0 %vm35_vm2, %v229_v3 }
  0xd9   :  { %v122_v7 = vpop.f32.mrb[0].mxu1 }
  0xda   :  { %v154_v9 = vmul.f32 %v198_v6, %v122_v7  ;;  %v225_v10 = vpop.f32.mrb[1].mxu1 }
  0xdb   :  { %v77_v11 = vpop.f32.mrb[0].mxu0  ;;  %v125_v12 = vpop.f32.mrb[2].mxu1 }
  0xdc   :  { %v219_v13 = vpop.f32.mrb[1].mxu0  ;;  %v163_v14 = vadd.f32 %v199_v8, %v154_v9  ;;  %v155_v15 = vmul.f32 %v198_v6, %v125_v12  ;;  %v226_v16 = vpop.f32.mrb[3].mxu1  ;;  %v136_v27 = vmul.f32 %v196_v26, %v77_v11 }
  0xdd   :  { %v80_v17 = vpop.f32.mrb[2].mxu0 }
  0xde   :  { %v220_v18 = vpop.f32.mrb[3].mxu0  ;;  %v200_v19 = vmul.f32 -1.442695, %v163_v14  ;;  %v164_v20 = vadd.f32 %v199_v8, %v155_v15  ;;  %v145_v29 = vadd.f32 %v197_v28, %v136_v27  ;;  %v137_v30 = vmul.f32 %v196_v26, %v80_v17 }
  0xe0   :  { %230 = vpow2.f32 %v200_v19  ;;  %v201_v21 = vmul.f32 -1.442695, %v164_v20  ;;  %v146_v33 = vadd.f32 %v197_v28, %v137_v30 }
  0xe2   :  { %232 = vpow2.f32 %v201_v21 }
  0xea   :  { %v231_v22 = vpop.eup %230 }
  0xeb   :  { %v171_v23 = vadd.f32 1.0, %v231_v22 }
  0xec   :  { %v233_v24 = vpop.eup %232 }
  0xed   :  { %234 = vrcp.f32 %v171_v23  ;;  %v172_v25 = vadd.f32 1.0, %v233_v24 }
  0xef   :  { %236 = vrcp.f32 %v172_v25 }
  0xf7   :  { %v235_v31 = vpop.eup %234 }
  0xf8   :  { %v177_v32 = vmul.f32 %v235_v31, %v145_v29 }
  0xf9   :  { %v237_v34 = vpop.eup %236 }
  0xfa   :  { %v178_v35 = vmul.f32 %v237_v34, %v146_v33 }
  0xfc   :  { %v209_v36 = vpack.c.bf16 %v178_v35, %v177_v32 }
  0xfe   :  { %210 = vst [vmem:[%s311_s7] sm:$0xff] %v209_v36  }

</bundles_post_ra>
